<compile_context>
chip_gen: v5e
topology: v5e:2x2
jax: 0.10.0
libtpu: 0.0.40
codegen_flags: <defaults>
</compile_context>

<pallas_src>
import functools

import jax
import jax.numpy as jnp
from jax import lax
from jax.experimental import pallas as pl
from jax.experimental.pallas import tpu as pltpu


# --------------------------------- helpers -----------------------------------
def _round_up(a, b):
    return ((a + b - 1) // b) * b


def _device_vmem_bytes():
    try:
        return int(pltpu.get_tpu_info().vmem_capacity_bytes)
    except Exception:
        return 64 * 1024 * 1024  # conservative (v7x per-TensorCore VMEM)


def _choose_tiles(T, D, H, act_bytes, w_bytes, vmem_cap):
    """Pick (tile_t, tile_h) so the double-buffered working set fits VMEM.

    tile_t targets the weight-DMA / MXU break-even (~240 rows on v5e, ~700 on
    v6e, ~310/TC on v7x): 768 where 128 MiB VMEM is available (v5e/v6e), 512
    on 64 MiB parts (v7x), clamped for tiny inputs.  tile_h bounds the
    streamed W1/W2 blocks so the kernel also fits v7x's 64 MiB.
    """
    budget = (vmem_cap * 3) // 4  # headroom for compiler temporaries

    def need(tt, th):
        return (2 * tt * D * act_bytes      # token tile (double-buffered)
                + 2 * tt * D * 4            # f32 out tile (double-buffered)
                + 2 * 2 * D * th * w_bytes  # W1 + W2 blocks (double-buffered)
                + 4 * (th + D) * 4          # biases
                + tt * D * 4                # f32 accumulator scratch
                + 2 * tt * th * 4)          # hidden-activation temporaries

    target_t = 768 if vmem_cap >= (100 << 20) else 512
    tile_t = max(8, min(target_t, _round_up(T, 8)))

    h_cands = [H] + [c for c in range((H // 128) * 128, 127, -128)
                     if c < H and H % c == 0]
    while True:
        tile_h = next((c for c in h_cands if need(tile_t, c) <= budget),
                      h_cands[-1])
        if need(tile_t, tile_h) <= budget or tile_t <= 256:
            break
        tile_t = max(256, tile_t - 256)
    return tile_t, tile_h


def _make_group_metadata(group_sizes, num_tiles, tile_t, num_steps):
    """Megablocks-style (token-tile, expert) work-step metadata (sorted tokens).

    Returns int32 arrays:
      offsets:    (E+1,) token offsets of each expert's contiguous group.
      expert_ids: (num_steps,) expert handled by each work step.
      tile_ids:   (num_steps,) token tile handled by each work step.
    Padding steps (beyond the true number of overlaps, which is at most
    num_tiles + E - 1) clamp to the last tile / last expert and produce empty
    or idempotent writes inside the kernel.
    """
    E = group_sizes.shape[0]
    gs = group_sizes.astype(jnp.int32)
    ends = jnp.cumsum(gs)
    starts = jnp.concatenate([jnp.zeros((1,), jnp.int32), ends[:-1]])
    offsets = jnp.concatenate([jnp.zeros((1,), jnp.int32), ends])

    tile_lo = starts // tile_t
    tile_hi = jnp.maximum(ends - 1, 0) // tile_t
    steps = jnp.where(gs > 0, tile_hi - tile_lo + 1, 0)  # work steps per expert

    cum = jnp.cumsum(steps)
    cum_before = jnp.concatenate([jnp.zeros((1,), jnp.int32), cum[:-1]])

    s_idx = jnp.arange(num_steps, dtype=jnp.int32)
    expert_ids = jnp.sum((s_idx[:, None] >= cum[None, :]).astype(jnp.int32),
                         axis=1)
    expert_ids = jnp.minimum(expert_ids, E - 1)
    tile_ids = tile_lo[expert_ids] + (s_idx - cum_before[expert_ids])
    tile_ids = jnp.clip(tile_ids, 0, num_tiles - 1)
    return offsets, expert_ids.astype(jnp.int32), tile_ids.astype(jnp.int32)


# ----------------------------- kernel 1: router -------------------------------
def router_kernel(x_ref, gw_ref, gb_ref, xw_ref, win_ref, *, top_k):
    """softmax(x @ Wg + bg), top-k, overwrite-merge winner reduction (f32).

    PyTorch's `out[mask] = expert_output` loop means only the highest-index
    routed expert (with score > 0) of a token survives, so routing reduces to
    one winning expert per token; x is pre-scaled by its softmax weight here.
    """
    x = x_ref[...].astype(jnp.float32)
    logits = jnp.dot(x, gw_ref[...].astype(jnp.float32),
                     preferred_element_type=jnp.float32) + gb_ref[...]
    m = jnp.max(logits, axis=-1, keepdims=True)
    ex = jnp.exp(logits - m)                                  # unnormalized softmax

    tt, num_experts = ex.shape
    lane = lax.broadcasted_iota(jnp.int32, (tt, num_experts), 1)

    # Iterative top-k on the unnormalized scores (same ordering as softmax);
    # ties break toward the lowest index (torch.topk convention).
    remaining = ex
    selected = jnp.zeros(ex.shape, jnp.bool_)
    for _ in range(top_k):
        val = jnp.max(remaining, axis=-1, keepdims=True)
        is_max = remaining == val
        first = jnp.min(jnp.where(is_max, lane, num_experts),
                        axis=-1, keepdims=True)
        hit = lane == first
        selected = jnp.logical_or(selected, hit)
        remaining = jnp.where(hit, -jnp.inf, remaining)

    routed = jnp.logical_and(selected, ex > 0.0)              # torch: weights > 0
    win = jnp.max(jnp.where(routed, lane, -1), axis=-1, keepdims=True)
    win_ex = jnp.sum(jnp.where(lane == win, ex, 0.0), axis=-1, keepdims=True)
    denom = jnp.sum(ex, axis=-1, keepdims=True)
    win_w = win_ex / denom                                    # exact divide (once/tile)

    win_ref[...] = win.astype(jnp.int32)                      # top-1 always routed -> >= 0
    xw_ref[...] = (x * win_w).astype(xw_ref.dtype)


# ------------------------ kernel 2: grouped expert FFN ------------------------
def ffn_kernel(offs_ref, eids_ref, tids_ref,                  # scalar prefetch (SMEM)
               xw_ref, w1_ref, b1_ref, w2_ref, b2_ref,        # VMEM inputs
               out_ref,                                       # VMEM output
               acc_ref,                                       # VMEM scratch
               *, tile_t):
    """One (token-tile, expert) work step x one H-chunk of the expert FFN."""
    s = pl.program_id(0)                                      # work step
    h = pl.program_id(1)                                      # H chunk
    nh = pl.num_programs(1)

    e = eids_ref[s]
    t = tids_ref[s]
    g_start = offs_ref[e]
    g_end = offs_ref[e + 1]
    row0 = t * tile_t

    # Padding steps (static grid is an upper bound on real overlaps) have no
    # rows in range; real steps always overlap by construction.
    has_work = jnp.logical_and(g_end > row0, g_start < row0 + tile_t)

    @pl.when(jnp.logical_and(has_work, h == 0))
    def _init_acc():
        acc_ref[...] = jnp.zeros_like(acc_ref)

    @pl.when(has_work)
    def _accumulate():
        hid = jnp.dot(xw_ref[...], w1_ref[...],
                      preferred_element_type=jnp.float32)
        hid = jnp.maximum(hid + b1_ref[...], 0.0)             # ReLU, exact per H-chunk
        acc_ref[...] += jnp.dot(hid.astype(w2_ref.dtype), w2_ref[...],
                                preferred_element_type=jnp.float32)

    # Finalize on the last H chunk: add b2 and write only this expert's rows.
    rows = row0 + lax.broadcasted_iota(jnp.int32, (tile_t, 1), 0)
    mask = jnp.logical_and(rows >= g_start, rows < g_end)
    first_visit = g_start <= row0                             # first expert touching tile
    last_h = jnp.logical_and(has_work, h == nh - 1)

    @pl.when(jnp.logical_and(last_h, first_visit))
    def _store_fresh():
        y = acc_ref[...] + b2_ref[...]
        out_ref[...] = jnp.where(mask, y, 0.0).astype(out_ref.dtype)

    @pl.when(jnp.logical_and(last_h, jnp.logical_not(first_visit)))
    def _store_merge():
        y = (acc_ref[...] + b2_ref[...]).astype(out_ref.dtype)
        out_ref[...] = jnp.where(mask, y, out_ref[...])


# --------------------------------- wrapper ------------------------------------
def dynamic_moe_pallas(x, gw, gb, w1, b1, w2, b2, *, top_k,
                       compute_dtype=jnp.bfloat16):
    """DynamicMoE forward (eval mode; router noise branch skipped).

    Two Pallas kernels with grouped-matmul dispatch between them: tokens are
    sorted by winning expert in XLA, and scalar-prefetched group metadata
    drives data-dependent index_maps in the FFN kernel.
    # TODO(synk): on v7x, pass compute_dtype=jnp.float8_e4m3fn for the expert
    # weights (MXU-native fp8) to halve weight DMA / VMEM in the DMA-bound regime.
    """
    B, S, D = x.shape
    E = gw.shape[1]
    H = w1.shape[2]
    T = B * S
    top_k = int(min(top_k, E))

    vmem_cap = _device_vmem_bytes()
    act_bytes = jnp.dtype(compute_dtype).itemsize
    tile_t, tile_h = _choose_tiles(T, D, H, act_bytes, act_bytes, vmem_cap)
    T_pad = _round_up(T, tile_t)
    num_tiles = T_pad // tile_t
    num_h = H // tile_h
    num_steps = num_tiles + E - 1          # upper bound on (tile, expert) overlaps
    vmem_limit = int(min((vmem_cap * 9) // 10, 128 << 20))

    x_flat = x.reshape(T, D)               # native dtype; router upcasts in-kernel
    if T_pad != T:
        x_flat = jnp.pad(x_flat, ((0, T_pad - T), (0, 0)))

    gw32 = gw.astype(jnp.float32)
    gb32 = gb.astype(jnp.float32)
    w1c = w1.astype(compute_dtype)
    w2c = w2.astype(compute_dtype)
    b1c = b1.astype(jnp.float32)
    b2c = b2.astype(jnp.float32)

    # ---- pass 1: router (winning expert + pre-scaled tokens) ----
    xw, win = pl.pallas_call(
        functools.partial(router_kernel, top_k=top_k),
        out_shape=(jax.ShapeDtypeStruct((T_pad, D), compute_dtype),
                   jax.ShapeDtypeStruct((T_pad, 1), jnp.int32)),
        grid_spec=pltpu.PrefetchScalarGridSpec(
            num_scalar_prefetch=0,
            grid=(num_tiles,),
            in_specs=[pl.BlockSpec((tile_t, D), lambda i: (i, 0)),
                      pl.BlockSpec((D, E), lambda i: (0, 0)),
                      pl.BlockSpec((1, E), lambda i: (0, 0))],
            out_specs=(pl.BlockSpec((tile_t, D), lambda i: (i, 0)),
                       pl.BlockSpec((tile_t, 1), lambda i: (i, 0))),
        ),
        compiler_params=pltpu.CompilerParams(
            dimension_semantics=("parallel",),
            vmem_limit_bytes=vmem_limit),
    )(x_flat, gw32, gb32)

    # ---- XLA glue: sort tokens by winning expert, build group metadata ----
    win_flat = win[:, 0]
    order = jnp.argsort(win_flat)                       # stable sort by expert id
    sorted_xw = jnp.take(xw, order, axis=0)
    group_sizes = jnp.bincount(win_flat, length=E).astype(jnp.int32)
    offsets, expert_ids, tile_ids = _make_group_metadata(
        group_sizes, num_tiles, tile_t, num_steps)

    # ---- pass 2: grouped expert FFN over sorted tokens ----
    # TODO(synk): megacore sharding of work steps across TensorCores (split the
    # sorted-token range per core) is left out; both grid axes are sequential
    # because output tiles are revisited at group boundaries / over H chunks.
    out_sorted = pl.pallas_call(
        functools.partial(ffn_kernel, tile_t=tile_t),
        out_shape=jax.ShapeDtypeStruct((T_pad, D), jnp.float32),
        grid_spec=pltpu.PrefetchScalarGridSpec(
            num_scalar_prefetch=3,
            grid=(num_steps, num_h),
            in_specs=[
                # sorted tokens: tile picked via scalar-prefetched tile id
                pl.BlockSpec((tile_t, D),
                             lambda s, h, offs, eids, tids: (tids[s], 0)),
                # W1[e] streamed one H chunk at a time
                pl.BlockSpec((pl.Squeezed(), D, tile_h),
                             lambda s, h, offs, eids, tids: (eids[s], 0, h)),
                pl.BlockSpec((pl.Squeezed(), 1, tile_h),
                             lambda s, h, offs, eids, tids: (eids[s], 0, h)),
                pl.BlockSpec((pl.Squeezed(), tile_h, D),
                             lambda s, h, offs, eids, tids: (eids[s], h, 0)),
                pl.BlockSpec((pl.Squeezed(), 1, D),
                             lambda s, h, offs, eids, tids: (eids[s], 0, 0)),
            ],
            out_specs=pl.BlockSpec((tile_t, D),
                                   lambda s, h, offs, eids, tids: (tids[s], 0)),
            scratch_shapes=[pltpu.VMEM((tile_t, D), jnp.float32)],
        ),
        compiler_params=pltpu.CompilerParams(
            dimension_semantics=("arbitrary", "arbitrary"),
            vmem_limit_bytes=vmem_limit),
    )(offsets, expert_ids, tile_ids, sorted_xw, w1c, b1c, w2c, b2c)

    # ---- unsort and strip padding ----
    inv = jnp.zeros((T_pad,), jnp.int32).at[order].set(
        jnp.arange(T_pad, dtype=jnp.int32))
    out_flat = jnp.take(out_sorted, inv, axis=0)
    return out_flat[:T].reshape(B, S, D).astype(x.dtype)


# ----------------------------- pure-JAX reference -----------------------------
def dynamic_moe_ref(x, gw, gb, w1, b1, w2, b2, *, top_k):
    B, S, D = x.shape
    E = gw.shape[1]
    logits = x @ gw + gb[0]
    m = jnp.max(logits, axis=-1, keepdims=True)
    e = jnp.exp(logits - m)
    scores = e / jnp.sum(e, axis=-1, keepdims=True)
    topv, topi = lax.top_k(scores, top_k)
    dispatch = jnp.sum(jax.nn.one_hot(topi, E, dtype=x.dtype) * topv[..., None],
                       axis=-2)                               # (B,S,E)
    xf = x.reshape(-1, D)
    df = dispatch.reshape(-1, E)
    out = jnp.zeros_like(xf)
    for i in range(E):
        w = df[:, i:i + 1]
        xin = xf * w
        h = jnp.maximum(xin @ w1[i] + b1[i], 0.0)
        y = h @ w2[i] + b2[i]
        out = jnp.where(w > 0, y, out)                        # overwrite merge
    return out.reshape(B, S, D)


# ----------------------------------- main --------------------------------------
if __name__ == "__main__":
    B, S, D = 2, 8, 32
    E, TOP_K = 4, 2
    H = 4 * D

    key = jax.random.PRNGKey(0)
    kx, kg, kgb, k1, kb1, k2, kb2 = jax.random.split(key, 7)

    x = jax.random.normal(kx, (B, S, D), jnp.float32)
    gw = jax.random.normal(kg, (D, E), jnp.float32) * 0.1
    gb = jax.random.normal(kgb, (1, E), jnp.float32) * 0.1
    w1 = jax.random.normal(k1, (E, D, H), jnp.float32) * 0.1
    b1 = jax.random.normal(kb1, (E, 1, H), jnp.float32) * 0.1
    w2 = jax.random.normal(k2, (E, H, D), jnp.float32) * 0.1
    b2 = jax.random.normal(kb2, (E, 1, D), jnp.float32) * 0.1

    out = dynamic_moe_pallas(x, gw, gb, w1, b1, w2, b2, top_k=TOP_K)
    out = jax.block_until_ready(out)

    ref = dynamic_moe_ref(x, gw, gb, w1, b1, w2, b2, top_k=TOP_K)
    assert out.shape == (B, S, D)
    # Tolerance covers bf16 expert-matmul operands (f32 accumulation);
    # routing itself is exact f32 and the softmax divide is exact.
    assert jnp.allclose(out, ref, rtol=3e-2, atol=3e-2), "mismatch vs reference"

    print("KERNEL_OK")
</pallas_src>

<mosaic_0001>
module attributes {stable_mosaic.version = 11 : i64} {
  func.func @router_kernel(%arg0: i32, %arg1: memref<16x32xf32, #tpu.memory_space<vmem>>, %arg2: memref<32x4xf32, #tpu.memory_space<vmem>>, %arg3: memref<1x4xf32, #tpu.memory_space<vmem>>, %arg4: memref<16x32xbf16, #tpu.memory_space<vmem>>, %arg5: memref<16x1xi32, #tpu.memory_space<vmem>>) attributes {dimension_semantics = [#tpu.dimension_semantics<parallel>], iteration_bounds = array<i64: 1>, scalar_prefetch = 0 : i64, scratch_operands = 0 : i64, tpu.core_type = #tpu.core_type<tc>, window_params = [{transform_indices = @transform_0, window_bounds = array<i64: 16, 32>}, {pipeline_mode = #tpu.pipeline_mode<synchronous>, transform_indices = @transform_1, window_bounds = array<i64: 32, 4>}, {pipeline_mode = #tpu.pipeline_mode<synchronous>, transform_indices = @transform_2, window_bounds = array<i64: 1, 4>}, {transform_indices = @transform_3, window_bounds = array<i64: 16, 32>}, {transform_indices = @transform_4, window_bounds = array<i64: 16, 1>}]} {
    %c0 = arith.constant 0 : index
    %c0_0 = arith.constant 0 : index
    %0 = vector.load %arg1[%c0, %c0_0] : memref<16x32xf32, #tpu.memory_space<vmem>>, vector<16x32xf32>
    %c0_1 = arith.constant 0 : index
    %c0_2 = arith.constant 0 : index
    %1 = vector.load %arg2[%c0_1, %c0_2] : memref<32x4xf32, #tpu.memory_space<vmem>>, vector<32x4xf32>
    %cst = arith.constant dense<0.000000e+00> : vector<16x4xf32>
    %2 = tpu.matmul %0, %1, %cst {dimension_numbers = #tpu.dot_dimension_numbers<[1], [0], [0], [1], [0, 0, 1, 1], [], []>} : vector<16x32xf32>, vector<32x4xf32>, vector<16x4xf32> -> vector<16x4xf32>
    %c0_3 = arith.constant 0 : index
    %c0_4 = arith.constant 0 : index
    %3 = vector.load %arg3[%c0_3, %c0_4] : memref<1x4xf32, #tpu.memory_space<vmem>>, vector<1x4xf32>
    %4 = vector.broadcast %3 : vector<1x4xf32> to vector<16x4xf32>
    %5 = arith.addf %2, %4 : vector<16x4xf32>
    %cst_5 = arith.constant dense<0xFF800000> : vector<16xf32>
    %6 = vector.multi_reduction <maximumf>, %5, %cst_5 [1] : vector<16x4xf32> to vector<16xf32>
    %7 = vector.shape_cast %6 : vector<16xf32> to vector<16x1xf32>
    %8 = vector.broadcast %7 : vector<16x1xf32> to vector<16x4xf32>
    %9 = arith.subf %5, %8 : vector<16x4xf32>
    %10 = math.exp %9 : vector<16x4xf32>
    %11 = tpu.iota {dimensions = array<i32: 1>} : vector<16x4xi32>
    %false = arith.constant false
    %12 = vector.broadcast %false : i1 to vector<16x4xi1>
    %cst_6 = arith.constant dense<0xFF800000> : vector<16xf32>
    %13 = vector.multi_reduction <maximumf>, %10, %cst_6 [1] : vector<16x4xf32> to vector<16xf32>
    %14 = vector.shape_cast %13 : vector<16xf32> to vector<16x1xf32>
    %15 = vector.broadcast %14 : vector<16x1xf32> to vector<16x4xf32>
    %16 = arith.cmpf oeq, %10, %15 : vector<16x4xf32>
    %c4_i32 = arith.constant 4 : i32
    %17 = vector.broadcast %c4_i32 : i32 to vector<16x4xi32>
    %18 = arith.select %16, %11, %17 : vector<16x4xi1>, vector<16x4xi32>
    %cst_7 = arith.constant dense<2147483647> : vector<16xi32>
    %19 = vector.multi_reduction <minsi>, %18, %cst_7 [1] : vector<16x4xi32> to vector<16xi32>
    %20 = vector.shape_cast %19 : vector<16xi32> to vector<16x1xi32>
    %21 = vector.broadcast %20 : vector<16x1xi32> to vector<16x4xi32>
    %22 = arith.cmpi eq, %11, %21 : vector<16x4xi32>
    %23 = arith.ori %12, %22 : vector<16x4xi1>
    %cst_8 = arith.constant 0xFF800000 : f32
    %24 = vector.broadcast %cst_8 : f32 to vector<16x4xf32>
    %25 = arith.select %22, %24, %10 : vector<16x4xi1>, vector<16x4xf32>
    %cst_9 = arith.constant dense<0xFF800000> : vector<16xf32>
    %26 = vector.multi_reduction <maximumf>, %25, %cst_9 [1] : vector<16x4xf32> to vector<16xf32>
    %27 = vector.shape_cast %26 : vector<16xf32> to vector<16x1xf32>
    %28 = vector.broadcast %27 : vector<16x1xf32> to vector<16x4xf32>
    %29 = arith.cmpf oeq, %25, %28 : vector<16x4xf32>
    %c4_i32_10 = arith.constant 4 : i32
    %30 = vector.broadcast %c4_i32_10 : i32 to vector<16x4xi32>
    %31 = arith.select %29, %11, %30 : vector<16x4xi1>, vector<16x4xi32>
    %cst_11 = arith.constant dense<2147483647> : vector<16xi32>
    %32 = vector.multi_reduction <minsi>, %31, %cst_11 [1] : vector<16x4xi32> to vector<16xi32>
    %33 = vector.shape_cast %32 : vector<16xi32> to vector<16x1xi32>
    %34 = vector.broadcast %33 : vector<16x1xi32> to vector<16x4xi32>
    %35 = arith.cmpi eq, %11, %34 : vector<16x4xi32>
    %36 = arith.ori %23, %35 : vector<16x4xi1>
    %cst_12 = arith.constant 0.000000e+00 : f32
    %37 = vector.broadcast %cst_12 : f32 to vector<16x4xf32>
    %38 = arith.cmpf ogt, %10, %37 : vector<16x4xf32>
    %39 = arith.andi %36, %38 : vector<16x4xi1>
    %c-1_i32 = arith.constant -1 : i32
    %40 = vector.broadcast %c-1_i32 : i32 to vector<16x4xi32>
    %41 = arith.select %39, %11, %40 : vector<16x4xi1>, vector<16x4xi32>
    %cst_13 = arith.constant dense<-2147483648> : vector<16xi32>
    %42 = vector.multi_reduction <maxsi>, %41, %cst_13 [1] : vector<16x4xi32> to vector<16xi32>
    %43 = vector.shape_cast %42 : vector<16xi32> to vector<16x1xi32>
    %44 = vector.broadcast %43 : vector<16x1xi32> to vector<16x4xi32>
    %45 = arith.cmpi eq, %11, %44 : vector<16x4xi32>
    %cst_14 = arith.constant 0.000000e+00 : f32
    %46 = vector.broadcast %cst_14 : f32 to vector<16x4xf32>
    %47 = arith.select %45, %10, %46 : vector<16x4xi1>, vector<16x4xf32>
    %cst_15 = arith.constant dense<0.000000e+00> : vector<16xf32>
    %48 = vector.multi_reduction <add>, %47, %cst_15 [1] : vector<16x4xf32> to vector<16xf32>
    %49 = vector.shape_cast %48 : vector<16xf32> to vector<16x1xf32>
    %cst_16 = arith.constant dense<0.000000e+00> : vector<16xf32>
    %50 = vector.multi_reduction <add>, %10, %cst_16 [1] : vector<16x4xf32> to vector<16xf32>
    %51 = vector.shape_cast %50 : vector<16xf32> to vector<16x1xf32>
    %52 = arith.divf %49, %51 : vector<16x1xf32>
    %c0_17 = arith.constant 0 : index
    %c0_18 = arith.constant 0 : index
    %53 = vector.load %arg5[%c0_17, %c0_18] : memref<16x1xi32, #tpu.memory_space<vmem>>, vector<16x1xi32>
    tpu.vector_store %arg5[%c0_17, %c0_18], %43 {strides = array<i32>} : memref<16x1xi32, #tpu.memory_space<vmem>>, vector<16x1xi32>,
    %54 = vector.broadcast %52 : vector<16x1xf32> to vector<16x32xf32>
    %55 = arith.mulf %0, %54 : vector<16x32xf32>
    %56 = arith.truncf %55 : vector<16x32xf32> to vector<16x32xbf16>
    %c0_19 = arith.constant 0 : index
    %c0_20 = arith.constant 0 : index
    %57 = vector.load %arg4[%c0_19, %c0_20] : memref<16x32xbf16, #tpu.memory_space<vmem>>, vector<16x32xbf16>
    tpu.vector_store %arg4[%c0_19, %c0_20], %56 {strides = array<i32>} : memref<16x32xbf16, #tpu.memory_space<vmem>>, vector<16x32xbf16>,
    return
  }
  func.func @transform_0(%arg0: i32) -> (i32, i32) {
    %c0_i32 = arith.constant 0 : i32
    %c0_i32_0 = arith.constant 0 : i32
    return %arg0, %c0_i32 : i32, i32
  }
  func.func @transform_1(%arg0: i32) -> (i32, i32) {
    %c0_i32 = arith.constant 0 : i32
    %c0_i32_0 = arith.constant 0 : i32
    %c0_i32_1 = arith.constant 0 : i32
    return %c0_i32, %c0_i32_0 : i32, i32
  }
  func.func @transform_2(%arg0: i32) -> (i32, i32) {
    %c0_i32 = arith.constant 0 : i32
    %c0_i32_0 = arith.constant 0 : i32
    %c0_i32_1 = arith.constant 0 : i32
    return %c0_i32, %c0_i32_0 : i32, i32
  }
  func.func @transform_3(%arg0: i32) -> (i32, i32) {
    %c0_i32 = arith.constant 0 : i32
    %c0_i32_0 = arith.constant 0 : i32
    return %arg0, %c0_i32 : i32, i32
  }
  func.func @transform_4(%arg0: i32) -> (i32, i32) {
    %c0_i32 = arith.constant 0 : i32
    %c0_i32_0 = arith.constant 0 : i32
    return %arg0, %c0_i32 : i32, i32
  }
}

</mosaic_0001>

<bundles_post_ra>
// kernel: tpu_custom_call.1
= control target key start
LH: loop header
LB: loop body
LE: loop exit
PB: predicated region body
PF: predicated region fallthrough
CT: control target
= control target key end

     0   :  { %s440_s0 = inlined_call_operand.vmem [shape: f32[16,32], index: 0, kind: input, shape index: {}]   ;;  %s441_s1 = inlined_call_operand.vmem [shape: f32[32,4], index: 1, kind: input, shape index: {}]   ;;  %s442_s2 = inlined_call_operand.vmem [shape: f32[1,4], index: 2, kind: input, shape index: {}]   ;;  %s443_s3 = inlined_call_operand.hbm [shape: bf16[16,32], index: 3, kind: output, shape index: {0}]   ;;  %s444_s4 = inlined_call_operand.vmem [shape: s32[16,1], index: 4, kind: output, shape index: {1}]  }
   0x1   :  { %v22_v0 = vld [vmem:[%s441_s1 + $0x18] sm:$0xff]  ;;  %v21_v1 = vld [vmem:[%s441_s1 + $0x10] sm:$0xff]  ;;  %v20_v2 = vld [vmem:[%s441_s1 + $0x8] sm:$0xff] }
   0x2   :  { %46 = vmatpush.msra.mxu0 %v22_v0  ;;  %276 = vmatpush.msra.mxu1 %v22_v0 }
   0x3   :  { %10 = vsyncpa [#allocation3], 0  ;;  %v19_v3 = vld [vmem:[%s441_s1] sm:$0xff]  ;;  %vm27_vm0 = vcmask 261120   ;;  %v366_v5 = vld [vmem:[%s440_s0 + $0x8] sm:$0xff]  ;;  %vm57_vm1 = vcmask 31744   ;;  %v70_v23 = vlaneseq }
   0x4   :  { %47 = vmatpush.msra.mxu0 %v21_v1  ;;  %277 = vmatpush.msra.mxu1 %v21_v1  ;;  %v361_v4 = vld [vmem:[%s440_s0] sm:$0xff]  ;;  %s258_s7 = sshll.u32 %s443_s3, 4  ;;  %s319_s8 = smov 64   ;;  %s259_s7 = int_to_ptr.hbm [resolvable:$true] %s258_s7 }
   0x5   :  { %v283_v6 = vld [vmem:[%s442_s2] ss:$0 sm:$0xff]  ;;  %v383_v24 = vand.u32 127, %v70_v23  ;;  %s320_s9 = smov 4  }
   0x6   :  { %48 = vmatpush.msra.mxu0 %v20_v2  ;;  %278 = vmatpush.msra.mxu1 %v20_v2 }
   0x8   :  { %49 = vmatpush.msra.mxu0 %v19_v3  ;;  %279 = vmatpush.msra.mxu1 %v19_v3 }
   0x9   :  { %274 = vmatmul.msk.f32.vlgmr.msra.gmra.mxu0 %vm27_vm0, %v361_v4  ;;  %275 = vmatmul.msk.f32.vlgmr.msra.gmra.mxu1 %vm27_vm0, %v366_v5 }
  0x86   :  { %v51_v7 = vpop.f32.mrf.mxu0  ;;  %v54_v9 = vpop.f32.mrf.mxu1 }
  0x87   :  { %v52_v8 = vadd.f32 %v283_v6, %v51_v7  ;;  %v55_v11 = vadd.f32 %v283_v6, %v54_v9 }
  0x89   :  { %v58_v10 = vsel %vm57_vm1, %v52_v8, -inf  ;;  %v61_v12 = vsel %vm57_vm1, %v55_v11, -inf }
  0x8a   :  { %59 = vmax.xlane.f32.xlu0 %v58_v10 }
  0x92   :  { %62 = vmax.xlane.f32.xlu0 %v61_v12 }
  0xfd   :  { %v60_v13 = vpop.xlane.xlu0 %59 }
  0xfe   :  { %v64_v14 = vsub.f32 %v52_v8, %v60_v13 }
 0x100   :  { %v66_v15 = vmul.f32 1.442695, %v64_v14 }
 0x102   :  { %284 = vpow2.f32 %v66_v15 }
 0x105   :  { %v63_v16 = vpop.xlane.xlu0 %62 }
 0x106   :  { %v65_v17 = vsub.f32 %v55_v11, %v63_v16 }
 0x108   :  { %v375_v18 = vpop.eup %284  ;;  %v68_v19 = vmul.f32 1.442695, %v65_v17 }
 0x109   :  { %v72_v20 = vsel %vm57_vm1, %v375_v18, -inf  ;;  %vm160_vm14 = vcmp.gt.f32.partialorder %v375_v18, 0.0 }
 0x10a   :  { %286 = vpow2.f32 %v68_v19  ;;  %73 = vmax.xlane.f32.xlu1 %v72_v20 }
 0x110   :  { %v379_v21 = vpop.eup %286 }
 0x111   :  { %v75_v22 = vsel %vm57_vm1, %v379_v21, -inf }
 0x112   :  { %76 = vmax.xlane.f32.xlu1 %v75_v22 }
 0x17d   :  { %v74_v25 = vpop.xlane.xlu1 %73 }
 0x17e   :  { %vm78_vm2 = vcmp.eq.f32.partialorder %v375_v18, %v74_v25 }
 0x17f   :  { %v80_v26 = vsel %vm78_vm2, %v383_v24, 4 }
 0x180   :  { %v82_v27 = vsel %vm57_vm1, %v80_v26, 2147483647 }
 0x181   :  { %v84_v28 = vshra.s32 %v82_v27, 16  ;;  %v83_v35 = vand.u32 65535, %v82_v27 }
 0x183   :  { %v86_v29 = vcvt.s32.f32 %v84_v28  ;;  %v85_v37 = vcvt.s32.f32 %v83_v35 }
 0x185   :  { %87 = vmin.xlane.f32.xlu2 %v86_v29  ;;  %v77_v30 = vpop.xlane.xlu1 %76 }
 0x186   :  { %vm79_vm3 = vcmp.eq.f32.partialorder %v379_v21, %v77_v30 }
 0x187   :  { %v81_v31 = vsel %vm79_vm3, %v383_v24, 4  ;;  %vm161_vm3 = vcmp.gt.f32.partialorder %v379_v21, 0.0 }
 0x188   :  { %v97_v32 = vsel %vm57_vm1, %v81_v31, 2147483647 }
 0x189   :  { %v99_v33 = vshra.s32 %v97_v32, 16  ;;  %v98_v39 = vand.u32 65535, %v97_v32 }
 0x18b   :  { %v101_v34 = vcvt.s32.f32 %v99_v33  ;;  %v100_v41 = vcvt.s32.f32 %v98_v39 }
 0x18d   :  { %102 = vmin.xlane.f32.xlu2 %v101_v34 }
 0x1f8   :  { %v88_v36 = vpop.xlane.xlu2 %87 }
 0x1f9   :  { %vm89_vm4 = vcmp.eq.f32.partialorder %v86_v29, %v88_v36  ;;  %v94_v43 = vcvt.f32.s32 %v88_v36 }
 0x1fa   :  { %v90_v38 = vsel %vm89_vm4, %v85_v37, inf }
 0x1fb   :  { %91 = vmin.xlane.f32.xlu0 %v90_v38  ;;  %v95_v45 = vshll.u32 %v94_v43, 16 }
 0x200   :  { %v103_v40 = vpop.xlane.xlu2 %102 }
 0x201   :  { %vm104_vm5 = vcmp.eq.f32.partialorder %v101_v34, %v103_v40  ;;  %v109_v48 = vcvt.f32.s32 %v103_v40  ;;  %v206_v34 = vsel %vm57_vm1, %v375_v18, 0.0 }
 0x202   :  { %v105_v42 = vsel %vm104_vm5, %v100_v41, inf }
 0x203   :  { %106 = vmin.xlane.f32.xlu1 %v105_v42  ;;  %v110_v52 = vshll.u32 %v109_v48, 16  ;;  %v209_v42 = vsel %vm57_vm1, %v379_v21, 0.0 }
 0x26e   :  { %v92_v44 = vpop.xlane.xlu0 %91 }
 0x26f   :  { %v93_v46 = vcvt.f32.s32 %v92_v44 }
 0x271   :  { %v96_v47 = vadd.s32 %v95_v45, %v93_v46 }
 0x273   :  { %vm112_vm6 = vcmp.eq.s32.totalorder %v383_v24, %v96_v47 }
 0x274   :  { %v114_v49 = vsel %vm112_vm6, -inf, %v375_v18 }
 0x275   :  { %v116_v50 = vsel %vm57_vm1, %v114_v49, -inf }
 0x276   :  { %v107_v51 = vpop.xlane.xlu1 %106  ;;  %117 = vmax.xlane.f32.xlu2 %v116_v50 }
 0x277   :  { %v108_v53 = vcvt.f32.s32 %v107_v51 }
 0x279   :  { %v111_v54 = vadd.s32 %v110_v52, %v108_v53 }
 0x27b   :  { %vm113_vm7 = vcmp.eq.s32.totalorder %v383_v24, %v111_v54 }
 0x27c   :  { %v115_v55 = vsel %vm113_vm7, -inf, %v379_v21 }
 0x27d   :  { %v119_v56 = vsel %vm57_vm1, %v115_v55, -inf }
 0x27e   :  { %120 = vmax.xlane.f32.xlu0 %v119_v56 }
 0x2e9   :  { %v118_v57 = vpop.xlane.xlu2 %117 }
 0x2ea   :  { %vm122_vm8 = vcmp.eq.f32.partialorder %v114_v49, %v118_v57 }
 0x2eb   :  { %v124_v58 = vsel %vm122_vm8, %v383_v24, 4 }
 0x2ec   :  { %v126_v59 = vsel %vm57_vm1, %v124_v58, 2147483647 }
 0x2ed   :  { %v128_v60 = vshra.s32 %v126_v59, 16  ;;  %v127_v3 = vand.u32 65535, %v126_v59 }
 0x2ef   :  { %v130_v61 = vcvt.s32.f32 %v128_v60  ;;  %v129_v7 = vcvt.s32.f32 %v127_v3 }
 0x2f1   :  { %131 = vmin.xlane.f32.xlu1 %v130_v61  ;;  %v121_v62 = vpop.xlane.xlu0 %120 }
 0x2f2   :  { %vm123_vm9 = vcmp.eq.f32.partialorder %v115_v55, %v121_v62 }
 0x2f3   :  { %v125_v63 = vsel %vm123_vm9, %v383_v24, 4 }
 0x2f4   :  { %v141_v0 = vsel %vm57_vm1, %v125_v63, 2147483647 }
 0x2f5   :  { %v143_v1 = vshra.s32 %v141_v0, 16  ;;  %v142_v9 = vand.u32 65535, %v141_v0 }
 0x2f7   :  { %v145_v2 = vcvt.s32.f32 %v143_v1  ;;  %v144_v11 = vcvt.s32.f32 %v142_v9 }
 0x2f9   :  { %146 = vmin.xlane.f32.xlu2 %v145_v2 }
 0x364   :  { %v132_v6 = vpop.xlane.xlu1 %131 }
 0x365   :  { %vm133_vm10 = vcmp.eq.f32.partialorder %v130_v61, %v132_v6  ;;  %v138_v13 = vcvt.f32.s32 %v132_v6 }
 0x366   :  { %v134_v8 = vsel %vm133_vm10, %v129_v7, inf }
 0x367   :  { %135 = vmin.xlane.f32.xlu0 %v134_v8  ;;  %v139_v15 = vshll.u32 %v138_v13, 16 }
 0x36c   :  { %v147_v10 = vpop.xlane.xlu2 %146 }
 0x36d   :  { %vm148_vm11 = vcmp.eq.f32.partialorder %v145_v2, %v147_v10  ;;  %v153_v19 = vcvt.f32.s32 %v147_v10 }
 0x36e   :  { %v149_v12 = vsel %vm148_vm11, %v144_v11, inf }
 0x36f   :  { %150 = vmin.xlane.f32.xlu1 %v149_v12  ;;  %v154_v23 = vshll.u32 %v153_v19, 16 }
 0x3da   :  { %v136_v14 = vpop.xlane.xlu0 %135 }
 0x3db   :  { %v137_v16 = vcvt.f32.s32 %v136_v14 }
 0x3dd   :  { %v140_v17 = vadd.s32 %v139_v15, %v137_v16 }
 0x3df   :  { %vm156_vm12 = vcmp.eq.s32.totalorder %v383_v24, %v140_v17 }
 0x3e0   :  { %vm158_vm13 = vmor %vm112_vm6, %vm156_vm12 }
 0x3e1   :  { %vm162_vm15 = vmand %vm158_vm13, %vm160_vm14 }
 0x3e2   :  { %v151_v20 = vpop.xlane.xlu1 %150  ;;  %v164_v22 = vsel %vm162_vm15, %v383_v24, 4294967295  ;;  %vm249_vm15 = vcmask 257024  }
 0x3e3   :  { %v152_v25 = vcvt.f32.s32 %v151_v20  ;;  %v166_v26 = vsel %vm57_vm1, %v164_v22, 2147483648 }
 0x3e4   :  { %v168_v27 = vshra.s32 %v166_v26, 16  ;;  %v167_v35 = vand.u32 65535, %v166_v26 }
 0x3e5   :  { %v155_v28 = vadd.s32 %v154_v23, %v152_v25 }
 0x3e6   :  { %v170_v29 = vcvt.s32.f32 %v168_v27  ;;  %v169_v37 = vcvt.s32.f32 %v167_v35 }
 0x3e7   :  { %vm157_vm0 = vcmp.eq.s32.totalorder %v383_v24, %v155_v28 }
 0x3e8   :  { %vm159_vm2 = vmor %vm113_vm7, %vm157_vm0  ;;  %171 = vmax.xlane.f32.xlu2 %v170_v29  ;;  %vm242_vm7 = vcmask 7168  }
 0x3e9   :  { %vm163_vm4 = vmand %vm159_vm2, %vm161_vm3 }
 0x3ea   :  { %v165_v30 = vsel %vm163_vm4, %v383_v24, 4294967295 }
 0x3eb   :  { %v181_v31 = vsel %vm57_vm1, %v165_v30, 2147483648 }
 0x3ec   :  { %v183_v32 = vshra.s32 %v181_v31, 16  ;;  %v182_v39 = vand.u32 65535, %v181_v31 }
 0x3ee   :  { %v185_v33 = vcvt.s32.f32 %v183_v32  ;;  %v184_v41 = vcvt.s32.f32 %v182_v39 }
 0x3f0   :  { %186 = vmax.xlane.f32.xlu0 %v185_v33 }
 0x3f8   :  { %207 = vadd.xlane.f32.xlu0 %v206_v34 }
 0x45b   :  { %v172_v36 = vpop.xlane.xlu2 %171 }
 0x45c   :  { %vm173_vm5 = vcmp.eq.f32.partialorder %v170_v29, %v172_v36  ;;  %v178_v44 = vcvt.f32.s32 %v172_v36 }
 0x45d   :  { %v174_v38 = vsel %vm173_vm5, %v169_v37, -inf }
 0x45e   :  { %175 = vmax.xlane.f32.xlu1 %v174_v38  ;;  %v179_v46 = vshll.u32 %v178_v44, 16 }
 0x463   :  { %v187_v40 = vpop.xlane.xlu0 %186 }
 0x464   :  { %vm188_vm6 = vcmp.eq.f32.partialorder %v185_v33, %v187_v40  ;;  %v193_v49 = vcvt.f32.s32 %v187_v40 }
 0x465   :  { %v189_v43 = vsel %vm188_vm6, %v184_v41, -inf }
 0x466   :  { %210 = vadd.xlane.f32.xlu1 %v209_v42  ;;  %190 = vmax.xlane.f32.xlu2 %v189_v43  ;;  %v194_v53 = vshll.u32 %v193_v49, 16 }
 0x46b   :  { %v208_v58 = vpop.xlane.xlu0 %207 }
 0x46c   :  { %288 = vrcp.f32 %v208_v58  ;;  %v223_v3 = vand.u32 2147483648, %v208_v58  ;;  %vm217_vm11 = vweird.f32 %v208_v58 }
 0x46e   :  { %v224_v7 = vor.u32 1.1754944e-38, %v223_v3 }
 0x472   :  { %v289_v59 = vpop.eup %288 }
 0x473   :  { %v213_v60 = vmul.f32 %v289_v59, %v208_v58  ;;  %vm218_vm10 = vweird.f32 %v289_v59 }
 0x474   :  { %vm219_vm12 = vmor %vm217_vm11, %vm218_vm10 }
 0x475   :  { %v214_v61 = vsub.f32 1.0, %v213_v60 }
 0x477   :  { %v215_v0 = vmul.f32 %v289_v59, %v214_v61 }
 0x479   :  { %v216_v2 = vadd.f32 %v289_v59, %v215_v0 }
 0x47b   :  { %v220_v6 = vsel %vm219_vm12, %v289_v59, %v216_v2 }
 0x4d1   :  { %v176_v45 = vpop.xlane.xlu1 %175 }
 0x4d2   :  { %v177_v47 = vcvt.f32.s32 %v176_v45 }
 0x4d4   :  { %v180_v48 = vadd.s32 %v179_v46, %v177_v47 }
 0x4d6   :  { %243 = vst.msk [vmem:[%s444_s4] sm:$0xff] %vm242_vm7, %v180_v48  ;;  %vm196_vm8 = vcmp.eq.s32.totalorder %v383_v24, %v180_v48 }
 0x4d7   :  { %v198_v50 = vsel %vm196_vm8, %v375_v18, 0.0 }
 0x4d8   :  { %v200_v51 = vsel %vm57_vm1, %v198_v50, 0.0 }
 0x4d9   :  { %201 = vadd.xlane.f32.xlu2 %v200_v51  ;;  %v191_v52 = vpop.xlane.xlu2 %190  ;;  %v211_v18 = vpop.xlane.xlu1 %210 }
 0x4da   :  { %v192_v54 = vcvt.f32.s32 %v191_v52  ;;  %290 = vrcp.f32 %v211_v18  ;;  %v238_v12 = vand.u32 2147483648, %v211_v18  ;;  %vm232_vm14 = vweird.f32 %v211_v18 }
 0x4db   :  { %v236_v14 = vand.u32 2147483647, %v211_v18 }
 0x4dc   :  { %v195_v55 = vadd.s32 %v194_v53, %v192_v54  ;;  %v239_v17 = vor.u32 1.1754944e-38, %v238_v12 }
 0x4dd   :  { %vm237_vm2 = vcmp.eq.f32.partialorder %v236_v14, 8.507059e+37 }
 0x4de   :  { %244 = vst.msk [vmem:[%s444_s4 + $0x8] sm:$0xff] %vm242_vm7, %v195_v55  ;;  %vm197_vm9 = vcmp.eq.s32.totalorder %v383_v24, %v195_v55  ;;  %v221_v24 = vand.u32 2147483647, %v208_v58  ;;  %s318_s4 = smov [#allocation2]  }
 0x4df   :  { %v199_v56 = vsel %vm197_vm9, %v379_v21, 0.0  ;;  %s256_s30 = sshll.u32 %s318_s4, 4  ;;  %s257_s30 = int_to_ptr.vmem [resolvable:$true] %s256_s30 }
 0x4e0   :  { %v203_v57 = vsel %vm57_vm1, %v199_v56, 0.0  ;;  %v291_v62 = vpop.eup %290  ;;  %vm222_vm1 = vcmp.eq.f32.partialorder %v221_v24, 8.507059e+37 }
 0x4e1   :  { %204 = vadd.xlane.f32.xlu0 %v203_v57  ;;  %v228_v63 = vmul.f32 %v291_v62, %v211_v18  ;;  %v225_v9 = vsel %vm222_vm1, %v224_v7, %v220_v6  ;;  %vm233_vm13 = vweird.f32 %v291_v62 }
 0x4e2   :  { %vm234_vm0 = vmor %vm232_vm14, %vm233_vm13 }
 0x4e3   :  { %v229_v1 = vsub.f32 1.0, %v228_v63 }
 0x4e5   :  { %v230_v21 = vmul.f32 %v291_v62, %v229_v1 }
 0x4e7   :  { %v231_v11 = vadd.f32 %v291_v62, %v230_v21 }
 0x4e9   :  { %v235_v16 = vsel %vm234_vm0, %v291_v62, %v231_v11 }
 0x4ea   :  { %v240_v19 = vsel %vm237_vm2, %v239_v17, %v235_v16 }
 0x54c   :  { %v202_v8 = vpop.xlane.xlu2 %201 }
 0x54d   :  { %v226_v10 = vmul.f32 %v225_v9, %v202_v8 }
 0x54f   :  { %v245_v13 = vmul.f32 %v226_v10, %v361_v4 }
 0x551   :  { %v247_v15 = vpack.c.bf16 %v245_v13, %v245_v13 }
 0x553   :  { %250 = vst.msk [vmem:[#allocation2] sm:$0xf] %vm249_vm15, %v247_v15 }
 0x554   :  { %v205_v20 = vpop.xlane.xlu0 %204 }
 0x555   :  { %v241_v22 = vmul.f32 %v240_v19, %v205_v20 }
 0x557   :  { %v246_v4 = vmul.f32 %v241_v22, %v366_v5 }
 0x559   :  { %v248_v23 = vpack.c.bf16 %v246_v4, %v246_v4 }
 0x55b   :  { %251 = vst.msk [vmem:[#allocation2 + $0x4] sm:$0xf] %vm249_vm15, %v248_v23 }
 0x55c   :  { %264 = dma.vmem_to_hbm [thread:$0]  %s257_s30, 128, %s259_s7, [#allocation3], %s319_s8, %s319_s8, %s320_s9  }
 0x55d   :  { %316 = dma.done.wait [#allocation3], 128  }
 0x55e   :  { %317 = vsyncadd [#allocation3], 4294967168 }
 0x55f   :  { %273 = vsyncpa [#allocation3], 1 }

</bundles_post_ra>
